<compile_context>
chip_gen: v6e
topology: v6e:2x2x1
jax: 0.10.0
libtpu: 0.0.40
codegen_flags: <defaults>
</compile_context>

<pallas_src>
import math

import jax
import jax.numpy as jnp
from jax.experimental import pallas as pl
from jax.experimental.pallas import tpu as pltpu

_LANES = 128  # lane width of a TPU vreg; last dim of every block


def _sigmoid_kernel(x_ref, o_ref):
    # Elementwise sigmoid on the current (block_rows, 128) VMEM block.
    o_ref[...] = jax.nn.sigmoid(x_ref[...])


def _cdiv(a: int, b: int) -> int:
    return -(-a // b)


def _round_up(x: int, m: int) -> int:
    return _cdiv(x, m) * m


def _sublane_multiple(dtype) -> int:
    # Minimum sublane tiling per dtype width (f32: 8, bf16: 16, int8/fp8: 32).
    itemsize = jnp.dtype(dtype).itemsize
    return {4: 8, 2: 16, 1: 32}.get(itemsize, 8)


def graph_sigmoid_features(features: jax.Array, *, max_block_rows: int = 4096) -> jax.Array:
    """Apply sigmoid to a feature array of any shape with a Pallas TPU kernel.

    The array is viewed as a lane-dense (rows, 128) slab; rows are tiled in
    large blocks (default 4096 rows = 2 MiB f32 per block) so the kernel runs
    near the HBM roofline on v5e / v6e / v7x.
    """
    orig_shape = features.shape
    total = int(math.prod(orig_shape))
    if total == 0:
        return features

    sub = _sublane_multiple(features.dtype)
    rows = _cdiv(total, _LANES)

    # Pick the row tile: as large as allowed, multiple of the sublane quantum.
    block_rows = min(_round_up(max_block_rows, sub), _round_up(rows, sub))
    padded_rows = _round_up(rows, block_rows)
    grid_n = padded_rows // block_rows

    # v7x has 2 TensorCores sharing the parallel grid axis; make sure there
    # are at least 2 grid steps when the slab is splittable.
    if grid_n == 1 and block_rows >= 2 * sub:
        block_rows = _round_up(_cdiv(block_rows, 2), sub)
        padded_rows = 2 * block_rows
        grid_n = 2

    # Flatten to a lane-dense slab, zero-padding up to a whole number of
    # full blocks (sigmoid of the padding is computed and discarded).
    flat = features.reshape(-1)
    pad = padded_rows * _LANES - total
    if pad:
        flat = jnp.pad(flat, (0, pad))
    x2d = flat.reshape(padded_rows, _LANES)

    out2d = pl.pallas_call(
        _sigmoid_kernel,
        out_shape=jax.ShapeDtypeStruct((padded_rows, _LANES), features.dtype),
        grid_spec=pltpu.PrefetchScalarGridSpec(
            num_scalar_prefetch=0,
            grid=(grid_n,),
            in_specs=[pl.BlockSpec((block_rows, _LANES), lambda i: (i, 0))],
            out_specs=pl.BlockSpec((block_rows, _LANES), lambda i: (i, 0)),
        ),
        compiler_params=pltpu.CompilerParams(
            dimension_semantics=("parallel",),
            # 2 arrays x 2 buffers x 2 MiB = 8 MiB needed; 32 MiB is safe on
            # v5e (128 MiB phys), v6e (128 MiB) and v7x (64 MiB per TC).
            vmem_limit_bytes=32 * 1024 * 1024,
        ),
    )(x2d)

    out_flat = out2d.reshape(-1)
    if pad:
        out_flat = out_flat[:total]
    return out_flat.reshape(orig_shape)


class Graph:
    """Minimal stand-in for the Graph container used by the PyTorch module."""

    def __init__(self, features: jax.Array):
        self._features = features

    def get_features(self) -> jax.Array:
        return self._features

    def set_features(self, features: jax.Array) -> None:
        self._features = features


class GraphSigmoid:
    """JAX/Pallas equivalent of the PyTorch GraphSigmoid module.

    No parameters (nn.Sigmoid has none) — nothing to initialize.
    """

    def __call__(self, graph: Graph) -> Graph:
        features = graph.get_features()
        features = graph_sigmoid_features(features)
        graph.set_features(features)
        return graph


if __name__ == "__main__":
    key = jax.random.PRNGKey(0)
    # Small graph: 64 nodes, 100 feature channels.  D=100 is deliberately NOT
    # a multiple of 128 to exercise the lane-dense flatten + pad path.
    num_nodes, feat_dim = 64, 100
    feats = jax.random.normal(key, (num_nodes, feat_dim), dtype=jnp.float32)

    graph = Graph(feats)
    module = GraphSigmoid()
    out_graph = module(graph)
    out = out_graph.get_features()
    jax.block_until_ready(out)

    # Correctness check against plain-JAX reference.
    ref = jax.nn.sigmoid(feats)
    assert out.shape == feats.shape and out.dtype == feats.dtype
    assert jnp.allclose(out, ref, atol=1e-6, rtol=1e-6)

    print("KERNEL_OK")
</pallas_src>

<mosaic_0001>
module attributes {stable_mosaic.version = 11 : i64} {
  func.func @_sigmoid_kernel(%arg0: i32, %arg1: memref<32x128xf32, #tpu.memory_space<vmem>>, %arg2: memref<32x128xf32, #tpu.memory_space<vmem>>) attributes {dimension_semantics = [#tpu.dimension_semantics<parallel>], iteration_bounds = array<i64: 2>, scalar_prefetch = 0 : i64, scratch_operands = 0 : i64, tpu.core_type = #tpu.core_type<tc>, window_params = [{transform_indices = @transform_0, window_bounds = array<i64: 32, 128>}, {transform_indices = @transform_1, window_bounds = array<i64: 32, 128>}]} {
    %c0 = arith.constant 0 : index
    %c0_0 = arith.constant 0 : index
    %0 = vector.load %arg1[%c0, %c0_0] : memref<32x128xf32, #tpu.memory_space<vmem>>, vector<32x128xf32>
    %1 = arith.negf %0 : vector<32x128xf32>
    %2 = math.exp %1 : vector<32x128xf32>
    %cst = arith.constant 1.000000e+00 : f32
    %3 = vector.broadcast %cst : f32 to vector<32x128xf32>
    %4 = arith.addf %3, %2 : vector<32x128xf32>
    %5 = arith.divf %3, %4 : vector<32x128xf32>
    %c0_1 = arith.constant 0 : index
    %c0_2 = arith.constant 0 : index
    %6 = vector.load %arg2[%c0_1, %c0_2] : memref<32x128xf32, #tpu.memory_space<vmem>>, vector<32x128xf32>
    tpu.vector_store %arg2[%c0_1, %c0_2], %5 {strides = array<i32>} : memref<32x128xf32, #tpu.memory_space<vmem>>, vector<32x128xf32>,
    return
  }
  func.func @transform_0(%arg0: i32) -> (i32, i32) {
    %c0_i32 = arith.constant 0 : i32
    %c0_i32_0 = arith.constant 0 : i32
    return %arg0, %c0_i32 : i32, i32
  }
  func.func @transform_1(%arg0: i32) -> (i32, i32) {
    %c0_i32 = arith.constant 0 : i32
    %c0_i32_0 = arith.constant 0 : i32
    return %arg0, %c0_i32 : i32, i32
  }
}

</mosaic_0001>

<bundles_post_ra>
// kernel: tpu_custom_call.1
= control target key start
LH: loop header
LB: loop body
LE: loop exit
PB: predicated region body
PF: predicated region fallthrough
CT: control target
= control target key end

     0   :  { %6 = vsyncpa [#allocation3], 0  ;;  %s606_s0 = inlined_call_operand.hbm [shape: f32[64,128], index: 0, kind: input, shape index: {}]   ;;  %s607_s1 = inlined_call_operand.hbm [shape: f32[64,128], index: 1, kind: output, shape index: {}]  }
   0x1   :  { %8 = vsyncpa [#allocation3 + $0x1], 0 }
   0x2   :  { %9 = vsyncpa [#allocation4], 0 }
   0x3   :  { %11 = vsyncpa [#allocation4 + $0x1], 0  ;;  %s452_s6 = smov 0   ;;  %s454_s7 = smov 0  }
   0x4   :  { %s456_s8 = smov 0   ;;  %s458_s9 = smov 0  }
   0x5 LB: > { %s473_s10 = sadd.s32 4294967295, %s434_s9   ;;  %s256_s11 = sadd.s32 4294967294, %s434_s9   ;;  %s434_s9 = sphi %s458_s9, %s622_s9   ;;  %s430_s8 = sphi %s456_s8, %s621_s8   ;;  %s426_s7 = sphi %s454_s7, %s620_s7   ;;  %s422_s6 = sphi %s452_s6, %s619_s6  }
   0x6   : > { %s477_s12 = sadd.s32 1, %s434_s9   ;;  %s24_s13 = sadd.s32 1, %s430_s8 }
   0x7   : > { %s21_s14 = ssub.s32 %s434_s9, %s477_s12  ;;  %p31_p0 = scmp.ne.s32.totalorder %s430_s8, %s426_s7 }
   0x8   : > { %p22_p1 = scmp.eq.s32.totalorder %s21_s14, 0  ;;  %p32_p2 = scmp.eq.s32.totalorder %s434_s9, 0 }
   0x9   : > { %p37_p3 = scmp.ne.s32.totalorder %s426_s7, %s422_s6  ;;  %p38_p4 = scmp.eq.s32.totalorder %s473_s10, 0 }
   0xa   : > { %s489_s15 = scalar_select %p22_p1, %s430_s8, %s24_s13  }
   0xb   : > { %p491_p5 = por %p32_p2, %p31_p0  ;;  %p495_p6 = por %p38_p4, %p37_p3 }
   0xc   : > { %p61_p7 = scmp.eq.s32.totalorder %s473_s10, 1  ;;  %p67_p8 = scmp.eq.s32.totalorder %s256_s11, 1 }
   0xd   : > { %s611_s17 = scalar_select %p495_p6, 1, 0 }
   0xe   : > { %p288_p10 = scmp.lt.s32.totalorder %s434_s9, 2  ;;  %p502_p11 = por %p61_p7, %p31_p0 }
   0xf   : > { %p506_p12 = por %p67_p8, %p37_p3  ;;  %s87_s20 = sand.u32 1, %s430_s8  }
  0x10   : > { %s612_s18 = scalar_select %p502_p11, 1, 0 }
  0x11   : > { %s613_s19 = scalar_select %p506_p12, 1, 0 }
  0x12   : > { %s274_s21 = sshll.u32 %s434_s9, 9  ;;  %s259_s22 = sshll.u32 %s87_s20, 5 }
  0x13   : > { %s515_s25 = scalar_lea.hbm %s606_s0, %s274_s21  ;;  %s91_s26 = scalar_lea.vmem [#allocation2], %s259_s22 }
  0x14   : > { %s98_s27 = sshll.u32 %s91_s26, 4  ;;  %p519_p13 = pnand %p288_p10, %p491_p5  ;;  %s523_s27 = int_to_ptr.vmem [resolvable:$true] %s98_s27 }
  0x15   : > { %s525_s29 = scalar_lea.sflag [#allocation3], %s87_s20  ;;  %s342_s30 = scalar_lea.hbm %s515_s25, 512 }
  0x16   : > { %p343_p0 = scmp.ne.s32.totalorder %s515_s25, %s342_s30  ;;  %p344_p1 = pneg %p519_p13 }
  0x17   : > { %s347_s4 = scalar_lea.hbm %s606_s0, 1024  ;;  %p348_p4 = scmp.lt.s32.totalorder %s515_s25, %s606_s0 }
  0x18   : > { %p345_p2 = pnand %p344_p1, %p343_p0  ;;  %p349_p5 = scmp.lt.s32.totalorder %s347_s4, %s342_s30 }
  0x1a   : > { %p346_p3 = pneg %p345_p2  ;;  %p350_p7 = por %p349_p5, %p348_p4 }
  0x1c   : > { %p351_p8 = pnand %p350_p7, %p346_p3 }
  0x1e   : > { %354 = shalt.err (!%p351_p8)
}
  0x1f   : > { %s355_s13 = scalar_lea.vmem %s523_s27, 512  ;;  %s436_s14 = smov [#allocation2]  }
  0x20   : > { %p356_p10 = scmp.ne.s32.totalorder %s523_s27, %s355_s13  ;;  %s360_s16 = sshll.u32 %s436_s14, 4  ;;  %s361_s16 = int_to_ptr.vmem [resolvable:$false] %s360_s16 }
  0x21   : > { %s362_s20 = scalar_lea.vmem %s361_s16, 1024  ;;  %p363_p2 = scmp.lt.s32.totalorder %s523_s27, %s361_s16 }
  0x22   : > { %p358_p9 = pnand %p356_p10, %p344_p1  ;;  %p364_p12 = scmp.lt.s32.totalorder %s362_s20, %s355_s13 }
  0x24   : > { %p359_p0 = pneg %p358_p9  ;;  %p365_p11 = por %p364_p12, %p363_p2 }
  0x26   : > { %p366_p6 = pnand %p365_p11, %p359_p0 }
  0x28   : > { %369 = shalt.err (!%p366_p6)
}
  0x29   : > { %s437_s21 = smov 128   ;;  %s438_s22 = smov 8  }
  0x2a   : > { %283 = dma.hbm_to_vmem [thread:$0]  (!%p519_p13), %s515_s25, 512, %s523_s27, %s525_s29, %s437_s21, %s437_s21, %s438_s22  }
  0x2b   : > { %p262_p9 = scmp.ge.s32.totalorder %s434_s9, 1  ;;  %p106_p1 = scmp.lt.s32.totalorder %s434_s9, 3 }
  0x2d   : > { %p107_p3 = pnand %p262_p9, %p106_p1 }
  0x2e   : > { %s549_s23 = sand.u32 (!%p107_p3), 1, %s426_s7   ;;  %p615_p6 = scmp.ne.s32.totalorder (!%p107_p3), %s611_s17, 0 }
  0x2f   : > { %110 = sbr.rel (%p107_p3) target bundleno = 103 (0x67), region = 24  ;;  %s263_s24 = sshll.u32 (!%p107_p3), %s549_s23, 5 }
  0x30   : > { %s113_s26 = scalar_lea.sflag (!%p107_p3), [#allocation3], %s549_s23  ;;  %s116_s30 = scalar_lea.vmem (!%p107_p3), [#allocation2], %s263_s24 }
  0x34   : > { %413 = dma.done.wait (%p615_p6), %s113_s26, 512  }
  0x35   : > { %415 = vsyncadd (%p615_p6), %s113_s26, 4294966784  ;;  %v137_v0 = vld [vmem:[%s116_s30] sm:$0xff]  ;;  %v138_v1 = vld [vmem:[%s116_s30 + $0x8] sm:$0xff]  ;;  %s134_s17 = scalar_lea.vmem [#allocation5], %s263_s24  ;;  %s275_s27 = sshll.u32 %s473_s10, 9 }
  0x36   : > { %v139_v2 = vld [vmem:[%s116_s30 + $0x10] sm:$0xff]  ;;  %v265_v3 = vmul.f32 -1.442695, %v137_v0  ;;  %v266_v4 = vmul.f32 -1.442695, %v138_v1  ;;  %v140_v6 = vld [vmem:[%s116_s30 + $0x18] sm:$0xff]  ;;  %s563_s2 = scalar_lea.hbm %s607_s1, %s275_s27 }
  0x37   : > { %v267_v5 = vmul.f32 -1.442695, %v139_v2  ;;  %v268_v7 = vmul.f32 -1.442695, %v140_v6  ;;  %s183_s25 = sshll.u32 %s134_s17, 4  ;;  %s170_s3 = scalar_lea.sflag [#allocation4], %s549_s23  ;;  %s558_s25 = int_to_ptr.vmem [resolvable:$true] %s183_s25 }
  0x38   : > { %326 = vpow2.f32 %v265_v3  ;;  %s370_s10 = scalar_lea.vmem %s558_s25, 512  ;;  %p616_p12 = scmp.ne.s32.totalorder %s612_s18, 0 }
  0x39   : > { %328 = vpow2.f32 %v266_v4  ;;  %p371_p11 = scmp.ne.s32.totalorder %s558_s25, %s370_s10  ;;  %s439_s4 = smov [#allocation5]  }
  0x3a   : > { %330 = vpow2.f32 %v267_v5  ;;  %s374_s5 = sshll.u32 %s439_s4, 4  ;;  %s375_s5 = int_to_ptr.vmem [resolvable:$false] %s374_s5 }
  0x3b   : > { %332 = vpow2.f32 %v268_v7  ;;  %p372_p13 = pnand %p371_p11, %p616_p12  ;;  %s376_s11 = scalar_lea.vmem %s375_s5, 1024 }
  0x3c   : > { %p377_p5 = scmp.lt.s32.totalorder %s558_s25, %s375_s5  ;;  %p378_p7 = scmp.lt.s32.totalorder %s376_s11, %s370_s10 }
  0x3d   : > { %p373_p4 = pneg %p372_p13 }
  0x3e   : > { %p379_p8 = por %p378_p7, %p377_p5 }
  0x40   : > { %p380_p10 = pnand %p379_p8, %p373_p4 }
  0x45   : > { %v327_v8 = vpop.eup %326 }
  0x46   : > { %v329_v9 = vpop.eup %328  ;;  %v153_v10 = vadd.f32 1.0, %v327_v8 }
  0x47   : > { %v331_v11 = vpop.eup %330  ;;  %v154_v12 = vadd.f32 1.0, %v329_v9 }
  0x48   : > { %v333_v13 = vpop.eup %332  ;;  %334 = vrcp.f32 %v153_v10  ;;  %v155_v14 = vadd.f32 1.0, %v331_v11 }
  0x49   : > { %336 = vrcp.f32 %v154_v12  ;;  %v156_v15 = vadd.f32 1.0, %v333_v13 }
  0x4a   : > { %338 = vrcp.f32 %v155_v14 }
  0x4b   : > { %340 = vrcp.f32 %v156_v15 }
  0x55   : > { %v335_v16 = vpop.eup %334 }
  0x56   : > { %v337_v17 = vpop.eup %336  ;;  %165 = vst [vmem:[%s134_s17] sm:$0xff] %v335_v16 }
  0x57   : > { %v339_v18 = vpop.eup %338  ;;  %166 = vst [vmem:[%s134_s17 + $0x8] sm:$0xff] %v337_v17 }
  0x58   : > { %v341_v19 = vpop.eup %340  ;;  %167 = vst [vmem:[%s134_s17 + $0x10] sm:$0xff] %v339_v18 }
  0x59   : > { %168 = vst [vmem:[%s134_s17 + $0x18] sm:$0xff] %v341_v19 }
  0x5a   : > { %383 = shalt.err (!%p380_p10)
}
  0x5b   : > { %s384_s13 = scalar_lea.hbm %s563_s2, 512  ;;  %s388_s20 = scalar_lea.hbm %s607_s1, 1024 }
  0x5c   : > { %p385_p0 = scmp.ne.s32.totalorder %s563_s2, %s384_s13  ;;  %p389_p1 = scmp.lt.s32.totalorder %s563_s2, %s607_s1 }
  0x5d   : > { %p390_p3 = scmp.lt.s32.totalorder %s388_s20, %s384_s13 }
  0x5e   : > { %p386_p2 = pnand %p385_p0, %p616_p12 }
  0x5f   : > { %p391_p6 = por %p390_p3, %p389_p1 }
  0x60   : > { %p387_p9 = pneg %p386_p2 }
  0x62   : > { %p392_p11 = pnand %p391_p6, %p387_p9 }
  0x64   : > { %395 = shalt.err (!%p392_p11)
}
  0x65   : > { %s440_s24 = smov 128   ;;  %s441_s26 = smov 8  }
  0x66   : > { %278 = dma.vmem_to_hbm [thread:$0]  (%p616_p12), %s558_s25, 512, %s563_s2, %s170_s3, %s440_s24, %s440_s24, %s441_s26  }
  0x67 PF: > { %s198_s30 = sand.u32 1, %s422_s6   ;;  %p617_p13 = scmp.ne.s32.totalorder %s613_s19, 0 }
  0x68   : > { %p618_p4 = scmp.ge.s32.totalorder %s434_s9, 2  ;;  %s199_s17 = scalar_lea.sflag [#allocation4], %s198_s30 }
  0x6a   : > { %p285_p5 = pnand %p618_p4, %p617_p13 }
  0x6c   : > { %p286_p7 = pneg %p285_p5 }
  0x6e   : > { %417 = dma.done.wait (%p286_p7), %s199_s17, 512  }
  0x6f   : > { %419 = vsyncadd (%p286_p7), %s199_s17, 4294966784  ;;  %p14_p8 = scmp.ge.s32.totalorder %s477_s12, 4   ;;  %s619_s6 = smov %s426_s7 }
  0x70   : > { %s620_s7 = smov %s430_s8  ;;  %s621_s8 = smov %s489_s15 }
  0x71   : > { %s622_s9 = smov %s477_s12  ;;  %16 = sbr.rel (!%p14_p8) target bundleno = 5 (0x5), region = 69 }
  0x76   :  { %204 = vsyncpa [#allocation3], 1 }
  0x77   :  { %206 = vsyncpa [#allocation3 + $0x1], 1 }
  0x78   :  { %207 = vsyncpa [#allocation4], 1 }
  0x79   :  { %209 = vsyncpa [#allocation4 + $0x1], 1 }

</bundles_post_ra>
